<compile_context>
chip_gen: v5e
topology: v5e:2x2
jax: 0.10.0
libtpu: 0.0.40
codegen_flags: <defaults>
</compile_context>

<pallas_src>
import functools

import jax
import jax.numpy as jnp
from jax.experimental import pallas as pl
from jax.experimental.pallas import tpu as pltpu


# ---------------------------------------------------------------------------
# Pass 1: spatial-sum reduction.  x and x_next are each read exactly once.
# ---------------------------------------------------------------------------
def _sum_kernel(x_ref, xn_ref, s_ref, *, hw_total, hw_tile, needs_mask):
    # x_ref, xn_ref : (n_tile, c_tile, hw_tile)  streamed, native dtype
    # s_ref         : (n_tile, c_tile) f32       resident across the hw axis
    @pl.when(pl.program_id(2) == 0)
    def _():
        s_ref[...] = jnp.zeros_like(s_ref)

    # Single cross-lane reduction per step (x + x_next summed together).
    v = x_ref[...].astype(jnp.float32) + xn_ref[...].astype(jnp.float32)
    if needs_mask:
        # The last hw tile extends past HW (inputs are NOT padded in HBM);
        # zero the out-of-range lanes BEFORE the reduction — load-bearing.
        lane = jax.lax.broadcasted_iota(jnp.int32, v.shape, 2)
        pos = pl.program_id(2) * hw_tile + lane
        v = jnp.where(pos < hw_total, v, 0.0)
    s_ref[...] += jnp.sum(v, axis=-1)


# ---------------------------------------------------------------------------
# Pass 2: tiny head — mean, relu, W matmul, sigmoid, pred_fc.  Fully in VMEM.
# ---------------------------------------------------------------------------
def _head_kernel(sums_ref, w_ref, p_ref, gate_ref, pred_ref, *, inv_hw):
    s = jnp.maximum(sums_ref[...] * inv_hw, 0.0)                     # (N, C) f32
    w = w_ref[...].astype(jnp.float32)                               # (C, C)
    # z = s @ W^T, consuming W untransposed (contract on dim 1 of both).
    z = jax.lax.dot_general(s, w, (((1,), (1,)), ((), ())),
                            preferred_element_type=jnp.float32)      # (N, C)
    gate_ref[...] = jax.nn.sigmoid(z)                                # (N, C) f32
    p = p_ref[...].astype(jnp.float32)                               # (K, C)
    pred_ref[...] = jax.lax.dot_general(
        z, p, (((1,), (1,)), ((), ())),
        preferred_element_type=jnp.float32).astype(pred_ref.dtype)   # (N, K)


# ---------------------------------------------------------------------------
# Pass 3: gating — stream x, broadcast the (n, c) gate over the lane axis.
# ---------------------------------------------------------------------------
def _gate_kernel(x_ref, gate_ref, o_ref):
    # Multiply in the input dtype (no full-tile f32 upcast -> fewer live
    # vregs).  For f32 inputs this is identical to the original math.
    g = gate_ref[...].astype(x_ref.dtype)[:, :, None]   # (n_tile, c_tile, 1)
    o_ref[...] = (x_ref[...] * g).astype(o_ref.dtype)


# ---------------------------------------------------------------------------
# Tile / VMEM-budget selection.
# ---------------------------------------------------------------------------
def _vmem_budget():
    """Generation-aware (per-tile byte budget, vmem_limit_bytes)."""
    cap = None
    try:
        cap = getattr(pltpu.get_tpu_info(), "vmem_capacity_bytes", None)
    except Exception:
        cap = None
    if cap is None:
        cap = 64 * 1024 * 1024                    # conservative: assume v7x
    if cap >= 100 * 1024 * 1024:                  # v5e / v6e (128 MiB VMEM)
        return 8 * 1024 * 1024, 64 * 1024 * 1024
    return 4 * 1024 * 1024, 40 * 1024 * 1024      # v7x (64 MiB VMEM)


def _round_up(v, m):
    return ((v + m - 1) // m) * m


def _pick_tiles(N, C, HW, itemsize, max_tile_bytes):
    # Batch tile: 8 rows (sublane multiple required by the (n, c) blocks) or
    # the full batch when small; block bytes stay independent of N.
    n_tile = N if N <= 8 else 8

    # Channel tile: the (n, c) sum/gate blocks put C on the lane axis, so the
    # tile must be the full C or a multiple of 128 that divides C.
    if C % 128 == 0:
        c_candidates = [m for m in range(C, 0, -128) if C % m == 0]
    else:
        c_candidates = [C]
    ci = 0
    c_tile = c_candidates[ci]

    # Spatial tile: lane-dense, start at the smallest multiple of 128 >= HW
    # (cdiv grid + in-kernel mask handles the tail, no divisibility needed).
    hw_tile = _round_up(HW, 128)

    def tile_bytes(ct, ht):
        return n_tile * ct * ht * itemsize

    # Shrink channels first (keeps contiguous DMA rows long), then spatial.
    while tile_bytes(c_tile, hw_tile) > max_tile_bytes and ci + 1 < len(c_candidates):
        ci += 1
        c_tile = c_candidates[ci]
    while tile_bytes(c_tile, hw_tile) > max_tile_bytes and hw_tile > 128:
        hw_tile = max(128, _round_up(hw_tile // 2, 128))

    # v7x megacore: ensure >= 2 steps on the parallel (n, c) axes when C
    # allows it, so both TensorCores work on the bandwidth-bound passes.
    n_steps = -(-N // n_tile)
    c_steps = -(-C // c_tile)
    if n_steps * c_steps < 2 and C % 256 == 0:
        c_tile = min(c_tile, C // 2)

    return n_tile, c_tile, hw_tile


# ---------------------------------------------------------------------------
# Wrapper.
# ---------------------------------------------------------------------------
def deep_explanation(x_nchw, x_next_nchw, w_weight, pred_fc_weight):
    """x_nchw, x_next_nchw: (N, C, H, W); w_weight: (C, C); pred_fc_weight: (K, C)."""
    N, C, H, W = x_nchw.shape
    K = pred_fc_weight.shape[0]
    HW = H * W
    dtype = x_nchw.dtype

    # Free reshapes for contiguous NCHW; NO padding round trips in HBM.
    x_flat = x_nchw.reshape(N, C, HW)
    xn_flat = x_next_nchw.reshape(N, C, HW)

    max_tile_bytes, vmem_limit = _vmem_budget()
    n_tile, c_tile, hw_tile = _pick_tiles(
        N, C, HW, jnp.dtype(dtype).itemsize, max_tile_bytes)
    grid = (pl.cdiv(N, n_tile), pl.cdiv(C, c_tile), pl.cdiv(HW, hw_tile))
    needs_mask = (HW % hw_tile) != 0

    stream_spec = pl.BlockSpec((n_tile, c_tile, hw_tile), lambda n, c, h: (n, c, h))
    nc_spec = pl.BlockSpec((n_tile, c_tile), lambda n, c, h: (n, c))

    # ---- Pass 1: raw channel sums of x + x_next -----------------------------
    sums = pl.pallas_call(
        functools.partial(_sum_kernel, hw_total=HW, hw_tile=hw_tile,
                          needs_mask=needs_mask),
        out_shape=jax.ShapeDtypeStruct((N, C), jnp.float32),
        grid=grid,
        in_specs=[stream_spec, stream_spec],
        out_specs=nc_spec,
        compiler_params=pltpu.CompilerParams(
            dimension_semantics=("parallel", "parallel", "arbitrary"),
            vmem_limit_bytes=vmem_limit,
        ),
    )(x_flat, xn_flat)

    # ---- Pass 2: tiny head (mean, relu, W, sigmoid, pred_fc) ----------------
    vmem = pl.BlockSpec(memory_space=pltpu.MemorySpace.VMEM)
    pred_dtype = jnp.promote_types(dtype, pred_fc_weight.dtype)
    gate, deep_pred = pl.pallas_call(
        functools.partial(_head_kernel, inv_hw=1.0 / HW),
        out_shape=(
            jax.ShapeDtypeStruct((N, C), jnp.float32),   # sigmoid gate (f32)
            jax.ShapeDtypeStruct((N, K), pred_dtype),    # deep_pred
        ),
        in_specs=[vmem, vmem, vmem],
        out_specs=(vmem, vmem),
        compiler_params=pltpu.CompilerParams(vmem_limit_bytes=vmem_limit),
    )(sums, w_weight, pred_fc_weight)

    # ---- Pass 3: stream x once more, apply the attention gate ---------------
    x_out = pl.pallas_call(
        _gate_kernel,
        out_shape=jax.ShapeDtypeStruct((N, C, HW), dtype),
        grid=grid,
        in_specs=[stream_spec, nc_spec],
        out_specs=stream_spec,
        compiler_params=pltpu.CompilerParams(
            dimension_semantics=("parallel", "parallel", "parallel"),
            vmem_limit_bytes=vmem_limit,
        ),
    )(x_flat, gate)

    return x_out.reshape(N, C, H, W), deep_pred


# ---------------------------------------------------------------------------
# Pure-JAX reference mirroring the PyTorch forward.
# ---------------------------------------------------------------------------
def _reference(x, x_next, w_weight, pred_fc_weight):
    s = jnp.mean(x, axis=(2, 3)) + jnp.mean(x_next, axis=(2, 3))
    s = jax.nn.relu(s)
    z = jnp.matmul(s, w_weight.T, precision=jax.lax.Precision.HIGHEST)
    gate = jax.nn.sigmoid(z)[:, :, None, None]
    x_out = x * gate
    deep_pred = jnp.matmul(z, pred_fc_weight.T,
                           precision=jax.lax.Precision.HIGHEST)
    return x_out, deep_pred


def _run_case(key, N, C, H, W, num_classes):
    k1, k2, k3, k4 = jax.random.split(key, 4)
    x = jax.random.normal(k1, (N, C, H, W), dtype=jnp.float32)
    x_next = jax.random.normal(k2, (N, C, H, W), dtype=jnp.float32)
    # Deterministic "module" parameters: nn.Linear(C, C) / nn.Linear(C, K).
    w_weight = jax.random.normal(k3, (C, C), dtype=jnp.float32) * 0.1
    pred_fc_weight = jax.random.normal(k4, (num_classes, C), dtype=jnp.float32) * 0.1

    x_out, deep_pred = deep_explanation(x, x_next, w_weight, pred_fc_weight)
    jax.block_until_ready((x_out, deep_pred))

    x_ref, pred_ref = _reference(x, x_next, w_weight, pred_fc_weight)
    # Tolerance covers TPU reduced-precision f32 matmul defaults in the head.
    assert jnp.allclose(x_out, x_ref, atol=2e-3, rtol=2e-3)
    assert jnp.allclose(deep_pred, pred_ref, atol=2e-3, rtol=2e-3)


if __name__ == "__main__":
    root = jax.random.PRNGKey(0)
    k_a, k_b = jax.random.split(root, 2)

    # Lane-aligned spatial size (H*W = 256 is a multiple of 128).
    _run_case(k_a, N=2, C=4, H=16, W=16, num_classes=8)
    # Non-multiple-of-128 spatial size (H*W = 49): exercises the in-kernel
    # tail mask and partial-block stores (no pad / slice HBM copies).
    _run_case(k_b, N=2, C=8, H=7, W=7, num_classes=8)

    print("KERNEL_OK")
</pallas_src>

<mosaic_0001>
module attributes {stable_mosaic.version = 11 : i64} {
  func.func @_sum_kernel(%arg0: i32, %arg1: i32, %arg2: i32, %arg3: memref<2x4x256xf32, #tpu.memory_space<vmem>>, %arg4: memref<2x4x256xf32, #tpu.memory_space<vmem>>, %arg5: memref<2x4xf32, #tpu.memory_space<vmem>>) attributes {dimension_semantics = [#tpu.dimension_semantics<parallel>, #tpu.dimension_semantics<parallel>, #tpu.dimension_semantics<arbitrary>], iteration_bounds = array<i64: 1, 1, 1>, scalar_prefetch = 0 : i64, scratch_operands = 0 : i64, tpu.core_type = #tpu.core_type<tc>, window_params = [{transform_indices = @transform_0, window_bounds = array<i64: 2, 4, 256>}, {transform_indices = @transform_1, window_bounds = array<i64: 2, 4, 256>}, {transform_indices = @transform_2, window_bounds = array<i64: 2, 4>}]} {
    %c0_i32 = arith.constant 0 : i32
    %0 = arith.cmpi eq, %arg2, %c0_i32 : i32
    %1 = arith.extui %0 : i1 to i32
    %c0_i32_0 = arith.constant 0 : i32
    %2 = arith.cmpi ne, %1, %c0_i32_0 : i32
    scf.if %2 {
      %cst_10 = arith.constant 0.000000e+00 : f32
      %10 = vector.broadcast %cst_10 : f32 to vector<2x4xf32>
      %c0_11 = arith.constant 0 : index
      %c0_12 = arith.constant 0 : index
      %11 = vector.load %arg5[%c0_11, %c0_12] : memref<2x4xf32, #tpu.memory_space<vmem>>, vector<2x4xf32>
      tpu.vector_store %arg5[%c0_11, %c0_12], %10 {strides = array<i32>} : memref<2x4xf32, #tpu.memory_space<vmem>>, vector<2x4xf32>,
    } else {
    }
    %c0 = arith.constant 0 : index
    %c0_1 = arith.constant 0 : index
    %c0_2 = arith.constant 0 : index
    %3 = vector.load %arg3[%c0, %c0_1, %c0_2] : memref<2x4x256xf32, #tpu.memory_space<vmem>>, vector<2x4x256xf32>
    %c0_3 = arith.constant 0 : index
    %c0_4 = arith.constant 0 : index
    %c0_5 = arith.constant 0 : index
    %4 = vector.load %arg4[%c0_3, %c0_4, %c0_5] : memref<2x4x256xf32, #tpu.memory_space<vmem>>, vector<2x4x256xf32>
    %5 = arith.addf %3, %4 : vector<2x4x256xf32>
    %c0_6 = arith.constant 0 : index
    %c0_7 = arith.constant 0 : index
    %6 = vector.load %arg5[%c0_6, %c0_7] : memref<2x4xf32, #tpu.memory_space<vmem>>, vector<2x4xf32>
    %cst = arith.constant dense<0.000000e+00> : vector<2x4xf32>
    %7 = vector.multi_reduction <add>, %5, %cst [2] : vector<2x4x256xf32> to vector<2x4xf32>
    %8 = arith.addf %6, %7 : vector<2x4xf32>
    %c0_8 = arith.constant 0 : index
    %c0_9 = arith.constant 0 : index
    %9 = vector.load %arg5[%c0_8, %c0_9] : memref<2x4xf32, #tpu.memory_space<vmem>>, vector<2x4xf32>
    tpu.vector_store %arg5[%c0_8, %c0_9], %8 {strides = array<i32>} : memref<2x4xf32, #tpu.memory_space<vmem>>, vector<2x4xf32>,
    return
  }
  func.func @transform_0(%arg0: i32, %arg1: i32, %arg2: i32) -> (i32, i32, i32) {
    %c0_i32 = arith.constant 0 : i32
    return %arg0, %arg1, %arg2 : i32, i32, i32
  }
  func.func @transform_1(%arg0: i32, %arg1: i32, %arg2: i32) -> (i32, i32, i32) {
    %c0_i32 = arith.constant 0 : i32
    return %arg0, %arg1, %arg2 : i32, i32, i32
  }
  func.func @transform_2(%arg0: i32, %arg1: i32, %arg2: i32) -> (i32, i32) {
    %c0_i32 = arith.constant 0 : i32
    return %arg0, %arg1 : i32, i32
  }
}

</mosaic_0001>

<bundles_post_ra>
// kernel: tpu_custom_call.1
= control target key start
LH: loop header
LB: loop body
LE: loop exit
PB: predicated region body
PF: predicated region fallthrough
CT: control target
= control target key end

     0   :  { %7 = vsyncpa [#allocation3], 0  ;;  %s227_s0 = inlined_call_operand.hbm [shape: f32[2,4,256], index: 0, kind: input, shape index: {}]   ;;  %s228_s1 = inlined_call_operand.hbm [shape: f32[2,4,256], index: 1, kind: input, shape index: {}]   ;;  %s229_s2 = inlined_call_operand.hbm [shape: f32[2,4], index: 2, kind: output, shape index: {}]  }
   0x1   :  { %8 = vsyncpa [#allocation6], 0 }
   0x2   :  { %9 = vsyncpa [#allocation4], 0  ;;  %s14_s11 = sshll.u32 %s227_s0, 4  ;;  %s195_s12 = smov [#allocation2]   ;;  %s15_s11 = int_to_ptr.hbm [resolvable:$true] %s14_s11 }
   0x3   :  { %s16_s13 = sshll.u32 %s195_s12, 4  ;;  %s27_s16 = sshll.u32 %s228_s1, 4  ;;  %s17_s13 = int_to_ptr.vmem [resolvable:$true] %s16_s13  ;;  %s28_s16 = int_to_ptr.hbm [resolvable:$true] %s27_s16 }
   0x4   :  { %s196_s17 = smov 128   ;;  %s197_s18 = smov 8  }
   0x5   :  { %22 = dma.hbm_to_vmem [thread:$0]  %s15_s11, 256, %s17_s13, [#allocation3], %s196_s17, %s196_s17, %s197_s18  }
   0x6   :  { %s198_s19 = smov [#allocation5]  }
   0x7   :  { %s29_s20 = sshll.u32 %s198_s19, 4  ;;  %s30_s20 = int_to_ptr.vmem [resolvable:$true] %s29_s20 }
   0x8   :  { %35 = dma.hbm_to_vmem [thread:$0]  %s28_s16, 256, %s30_s20, [#allocation6], %s196_s17, %s196_s17, %s197_s18  }
   0x9   :  { %189 = dma.done.wait [#allocation3], 256  }
   0xa   :  { %190 = vsyncadd [#allocation3], 4294967040 }
   0xb   :  { %191 = dma.done.wait [#allocation6], 256  }
   0xc   :  { %192 = vsyncadd [#allocation6], 4294967040  ;;  %v50_v0 = vld [vmem:[#allocation2] sm:$0xff]  ;;  %v52_v1 = vld [vmem:[#allocation5] sm:$0xff]  ;;  %vm70_vm0 = vcmask 1043456   ;;  %vm48_vm1 = vcmask 25600   ;;  %v83_v18 = vlaneseq }
   0xd   :  { %v51_v2 = vld [vmem:[#allocation2 + $0x8] sm:$0xff]  ;;  %v54_v3 = vadd.f32 %v52_v1, %v50_v0  ;;  %v53_v4 = vld [vmem:[#allocation5 + $0x8] sm:$0xff]  ;;  %v199_v16 = vmov 0.0   ;;  %vm87_vm2 = vcmask 1041409   ;;  %s200_s0 = smov [#allocation7]   ;;  %s100_s23 = sshll.u32 %s229_s2, 4  ;;  %s101_s23 = int_to_ptr.hbm [resolvable:$true] %s100_s23 }
   0xe   :  { %v55_v5 = vadd.f32 %v53_v4, %v51_v2  ;;  %49 = vst.msk [vmem:[#allocation7] sm:$0x3] %vm48_vm1, %v199_v16  ;;  %v84_v19 = vand.u32 127, %v83_v18  ;;  %s98_s1 = sshll.u32 %s200_s0, 4  ;;  %s99_s1 = int_to_ptr.vmem [resolvable:$true] %s98_s1 }
   0xf   :  { %59 = vst [vmem:[#allocation1] ss:$2 sm:$0xff] %v54_v3 }
  0x10   :  { %63 = vst [vmem:[#allocation1 + $0x10] ss:$2 sm:$0xff] %v55_v5 }
  0x15   :  { %v56_v22 = vld [vmem:[#allocation7] sm:$0x3] }
  0x16   :  { %v60_v6 = vld.sshfl [vmem:[#allocation1] sm:$0xff pattern:$0x75316420]  ;;  %v61_v7 = vld.sshfl [vmem:[#allocation1 + $0x8] sm:$0xff pattern:$0x75316420] }
  0x17   :  { %v71_v8 = vsel %vm70_vm0, %v60_v6, 0.0  ;;  %v72_v9 = vsel %vm70_vm0, %v61_v7, 0.0  ;;  %v64_v11 = vld.sshfl [vmem:[#allocation1 + $0x10] sm:$0xff pattern:$0x75316420] }
  0x18   :  { %v73_v10 = vadd.f32 %v72_v9, %v71_v8  ;;  %v65_v12 = vld.sshfl [vmem:[#allocation1 + $0x18] sm:$0xff pattern:$0x75316420]  ;;  %v76_v13 = vsel %vm70_vm0, %v64_v11, 0.0 }
  0x19   :  { %v77_v14 = vsel %vm70_vm0, %v65_v12, 0.0 }
  0x1a   :  { %74 = vadd.xlane.f32.xlu0 %v73_v10  ;;  %v78_v15 = vadd.f32 %v77_v14, %v76_v13 }
  0x22   :  { %79 = vadd.xlane.f32.xlu0 %v78_v15 }
  0x8d   :  { %v75_v17 = vpop.xlane.xlu0 %74 }
  0x8e   :  { %v85_v21 = vperm.slane %v75_v17, %v84_v19 }
  0x95   :  { %v80_v20 = vpop.xlane.xlu0 %79 }
  0x96   :  { %v86_v23 = vperm.slane %v80_v20, %v84_v19 }
  0x98   :  { %v88_v24 = vsel %vm87_vm2, %v86_v23, %v85_v21 }
  0x99   :  { %v90_v25 = vadd.f32 %v88_v24, %v56_v22 }
  0x9b   :  { %92 = vst.msk [vmem:[#allocation7] sm:$0x3] %vm48_vm1, %v90_v25 }
  0x9c   :  { %103 = dma.vmem_to_hbm [thread:$0]  %s99_s1, 32, %s101_s23, [#allocation4]  }
  0x9d   :  { %193 = dma.done.wait [#allocation4], 32  }
  0x9e   :  { %194 = vsyncadd [#allocation4], 4294967264 }
  0x9f   :  { %108 = vsyncpa [#allocation3], 1 }
  0xa0   :  { %109 = vsyncpa [#allocation6], 1 }
  0xa1   :  { %110 = vsyncpa [#allocation4], 1 }

</bundles_post_ra>
